<compile_context>
chip_gen: v7x
topology: tpu7x:2x2x1
jax: 0.10.0
libtpu: 0.0.40
codegen_flags: <defaults>
</compile_context>

<pallas_src>
import functools

import jax
import jax.numpy as jnp
from jax.experimental import pallas as pl
from jax.experimental.pallas import tpu as pltpu

EPS = 1e-5


def _dice_partial_kernel(pre_ref, tar_ref, inter_ref, union_ref, *,
                         d_sub, tile_d, needs_mask):
    """Accumulate per-(sample, fold-row) partial sums for one core's slice.

    pre_ref, tar_ref : (N, FC, TILE_D) VMEM tiles of this core's input slice
    inter_ref        : (N, FC) f32 output block, resident across chunk axis
    union_ref        : (N, FC) f32 output block, resident across chunk axis
    """
    k = pl.program_id(1)   # chunk index along the flattened (reduction) axis

    @pl.when(k == 0)
    def _():
        inter_ref[...] = jnp.zeros_like(inter_ref)
        union_ref[...] = jnp.zeros_like(union_ref)

    p = pre_ref[...].astype(jnp.float32)
    t = tar_ref[...].astype(jnp.float32)

    if needs_mask:
        # Last chunk may run past d_sub; Pallas leaves that region of the VMEM
        # block unspecified, so zero it before reducing (applies to both sums).
        lane = jax.lax.broadcasted_iota(jnp.int32, p.shape, dimension=2)
        valid = lane < (d_sub - k * tile_d)
        p = jnp.where(valid, p, 0.0)
        t = jnp.where(valid, t, 0.0)

    inter_ref[...] += jnp.sum(p * t, axis=-1)
    union_ref[...] += jnp.sum(p, axis=-1) + jnp.sum(t, axis=-1)


def _plan(n, d, itemsize, tile_d):
    """Pick (ncores, fold, d_sub, tile_d, num_chunks, needs_mask)."""
    ncores = 2 if d % 2 == 0 else 1          # split reduction across 2 TCs (v7x)
    fc = 1                                   # fold rows per core (sublane fill)
    for f in (8, 4, 2):
        if d % (ncores * f) == 0:
            fc = f
            break
    d_sub = d // (ncores * fc)               # flattened length per folded row

    if tile_d is None:
        # ~16 MiB budget for the double-buffered input tiles:
        # 2 inputs * 2 buffers * N * 8 (sublane-padded fold) * tile_d * itemsize
        budget = 16 * 1024 * 1024
        cap = budget // (2 * 2 * n * 8 * itemsize)
        cap = max(128, min(cap, 16384))
        cap = (cap // 128) * 128
        tile_d = cap
    else:
        tile_d = max(128, (int(tile_d) // 128) * 128)

    if d_sub <= tile_d:
        tile_d = d_sub                       # single full-row chunk
    nc = pl.cdiv(d_sub, tile_d)
    needs_mask = (d_sub % tile_d) != 0
    return ncores, fc, d_sub, tile_d, nc, needs_mask


@functools.partial(jax.jit, static_argnames=("tile_d",))
def dice_loss(predict, target, *, tile_d=None):
    assert predict.shape == target.shape, (
        "the size of predict and target must be equal.")
    n = predict.shape[0]
    d = 1
    for s in predict.shape[1:]:
        d *= s

    itemsize = max(jnp.dtype(predict.dtype).itemsize,
                   jnp.dtype(target.dtype).itemsize)
    ncores, fc, d_sub, tile_d, nc, needs_mask = _plan(n, d, itemsize, tile_d)

    # Free, contiguous reshapes (same element order as torch .view(num, -1)).
    pre = predict.reshape(n, ncores, fc, d_sub)
    tar = target.reshape(n, ncores, fc, d_sub)

    # Explicit VMEM limit with headroom (stays under v7x's 64 MiB physical).
    tile_bytes = 2 * 2 * n * 8 * tile_d * itemsize
    vmem_limit = int(min(max(2 * tile_bytes + (2 << 20), 16 << 20), 48 << 20))

    kernel = functools.partial(_dice_partial_kernel, d_sub=d_sub,
                               tile_d=tile_d, needs_mask=needs_mask)

    inter_parts, union_parts = pl.pallas_call(
        kernel,
        out_shape=(jax.ShapeDtypeStruct((ncores, n, fc), jnp.float32),
                   jax.ShapeDtypeStruct((ncores, n, fc), jnp.float32)),
        grid_spec=pltpu.PrefetchScalarGridSpec(
            num_scalar_prefetch=0,
            grid=(ncores, nc),
            in_specs=[
                pl.BlockSpec((n, None, fc, tile_d), lambda c, k: (0, c, 0, k)),
                pl.BlockSpec((n, None, fc, tile_d), lambda c, k: (0, c, 0, k)),
            ],
            out_specs=[
                pl.BlockSpec((None, n, fc), lambda c, k: (c, 0, 0)),
                pl.BlockSpec((None, n, fc), lambda c, k: (c, 0, 0)),
            ],
        ),
        compiler_params=pltpu.CompilerParams(
            dimension_semantics=("parallel", "arbitrary"),
            vmem_limit_bytes=vmem_limit,
        ),
    )(pre, tar)

    # Tiny O(N) epilogue: combine per-core / per-fold partials (keeps the two
    # TensorCores on v7x independent) and form the scalar dice loss.
    inter = jnp.sum(inter_parts, axis=(0, 2))   # (N,)
    union = jnp.sum(union_parts, axis=(0, 2))   # (N,)
    dice = (2.0 * inter + EPS) / (union + EPS)
    return 1.0 - jnp.sum(dice) / n


def dice_loss_ref(predict, target):
    n = predict.shape[0]
    pre = predict.reshape(n, -1).astype(jnp.float32)
    tar = target.reshape(n, -1).astype(jnp.float32)
    intersection = jnp.sum(pre * tar, axis=-1)
    union = jnp.sum(pre + tar, axis=-1)
    dice = (2.0 * intersection + EPS) / (union + EPS)
    return 1.0 - jnp.sum(dice) / n


if __name__ == "__main__":
    key = jax.random.PRNGKey(0)
    k1, k2 = jax.random.split(key)
    # NCHW, small shapes: batch=2, channels=4, spatial=16x16
    predict = jax.nn.sigmoid(
        jax.random.normal(k1, (2, 4, 16, 16), dtype=jnp.float32))
    target = (jax.random.uniform(k2, (2, 4, 16, 16)) > 0.5).astype(jnp.float32)

    loss = jax.block_until_ready(dice_loss(predict, target))
    ref = jax.block_until_ready(dice_loss_ref(predict, target))

    assert jnp.allclose(loss, ref, rtol=1e-5, atol=1e-5), (loss, ref)
    print("KERNEL_OK")
</pallas_src>

<mosaic_0001>
module attributes {stable_mosaic.version = 11 : i64} {
  func.func @_dice_partial_kernel(%arg0: i32, %arg1: i32, %arg2: memref<2x1x8x64xf32, #tpu.memory_space<vmem>>, %arg3: memref<2x1x8x64xf32, #tpu.memory_space<vmem>>, %arg4: memref<1x2x8xf32, #tpu.memory_space<vmem>>, %arg5: memref<1x2x8xf32, #tpu.memory_space<vmem>>) attributes {dimension_semantics = [#tpu.dimension_semantics<parallel>, #tpu.dimension_semantics<arbitrary>], iteration_bounds = array<i64: 2, 1>, scalar_prefetch = 0 : i64, scratch_operands = 0 : i64, tpu.core_type = #tpu.core_type<tc>, window_params = [{transform_indices = @transform_0, window_bounds = array<i64: 2, 1, 8, 64>}, {transform_indices = @transform_1, window_bounds = array<i64: 2, 1, 8, 64>}, {transform_indices = @transform_2, window_bounds = array<i64: 1, 2, 8>}, {transform_indices = @transform_3, window_bounds = array<i64: 1, 2, 8>}]} {
    %c0_i32 = arith.constant 0 : i32
    %0 = arith.cmpi eq, %arg1, %c0_i32 : i32
    %1 = arith.extui %0 : i1 to i32
    %c0_i32_0 = arith.constant 0 : i32
    %2 = arith.cmpi ne, %1, %c0_i32_0 : i32
    scf.if %2 {
      %cst_22 = arith.constant 0.000000e+00 : f32
      %24 = vector.broadcast %cst_22 : f32 to vector<2x8xf32>
      %c0_23 = arith.constant 0 : index
      %c0_24 = arith.constant 0 : index
      %c0_25 = arith.constant 0 : index
      %25 = vector.load %arg4[%c0_23, %c0_24, %c0_25] : memref<1x2x8xf32, #tpu.memory_space<vmem>>, vector<1x2x8xf32>
      %26 = vector.shape_cast %25 : vector<1x2x8xf32> to vector<2x8xf32>
      %27 = vector.shape_cast %24 : vector<2x8xf32> to vector<1x2x8xf32>
      tpu.vector_store %arg4[%c0_23, %c0_24, %c0_25], %27 {strides = array<i32>} : memref<1x2x8xf32, #tpu.memory_space<vmem>>, vector<1x2x8xf32>,
      %cst_26 = arith.constant 0.000000e+00 : f32
      %28 = vector.broadcast %cst_26 : f32 to vector<2x8xf32>
      %c0_27 = arith.constant 0 : index
      %c0_28 = arith.constant 0 : index
      %c0_29 = arith.constant 0 : index
      %29 = vector.load %arg5[%c0_27, %c0_28, %c0_29] : memref<1x2x8xf32, #tpu.memory_space<vmem>>, vector<1x2x8xf32>
      %30 = vector.shape_cast %29 : vector<1x2x8xf32> to vector<2x8xf32>
      %31 = vector.shape_cast %28 : vector<2x8xf32> to vector<1x2x8xf32>
      tpu.vector_store %arg5[%c0_27, %c0_28, %c0_29], %31 {strides = array<i32>} : memref<1x2x8xf32, #tpu.memory_space<vmem>>, vector<1x2x8xf32>,
    } else {
    }
    %c0 = arith.constant 0 : index
    %c0_1 = arith.constant 0 : index
    %c0_2 = arith.constant 0 : index
    %c0_3 = arith.constant 0 : index
    %3 = vector.load %arg2[%c0, %c0_1, %c0_2, %c0_3] : memref<2x1x8x64xf32, #tpu.memory_space<vmem>>, vector<2x1x8x64xf32>
    %4 = vector.shape_cast %3 : vector<2x1x8x64xf32> to vector<2x8x64xf32>
    %c0_4 = arith.constant 0 : index
    %c0_5 = arith.constant 0 : index
    %c0_6 = arith.constant 0 : index
    %c0_7 = arith.constant 0 : index
    %5 = vector.load %arg3[%c0_4, %c0_5, %c0_6, %c0_7] : memref<2x1x8x64xf32, #tpu.memory_space<vmem>>, vector<2x1x8x64xf32>
    %6 = vector.shape_cast %5 : vector<2x1x8x64xf32> to vector<2x8x64xf32>
    %c0_8 = arith.constant 0 : index
    %c0_9 = arith.constant 0 : index
    %c0_10 = arith.constant 0 : index
    %7 = vector.load %arg4[%c0_8, %c0_9, %c0_10] : memref<1x2x8xf32, #tpu.memory_space<vmem>>, vector<1x2x8xf32>
    %8 = vector.shape_cast %7 : vector<1x2x8xf32> to vector<2x8xf32>
    %9 = arith.mulf %4, %6 : vector<2x8x64xf32>
    %cst = arith.constant dense<0.000000e+00> : vector<2x8xf32>
    %10 = vector.multi_reduction <add>, %9, %cst [2] : vector<2x8x64xf32> to vector<2x8xf32>
    %11 = arith.addf %8, %10 : vector<2x8xf32>
    %c0_11 = arith.constant 0 : index
    %c0_12 = arith.constant 0 : index
    %c0_13 = arith.constant 0 : index
    %12 = vector.load %arg4[%c0_11, %c0_12, %c0_13] : memref<1x2x8xf32, #tpu.memory_space<vmem>>, vector<1x2x8xf32>
    %13 = vector.shape_cast %12 : vector<1x2x8xf32> to vector<2x8xf32>
    %14 = vector.shape_cast %11 : vector<2x8xf32> to vector<1x2x8xf32>
    tpu.vector_store %arg4[%c0_11, %c0_12, %c0_13], %14 {strides = array<i32>} : memref<1x2x8xf32, #tpu.memory_space<vmem>>, vector<1x2x8xf32>,
    %c0_14 = arith.constant 0 : index
    %c0_15 = arith.constant 0 : index
    %c0_16 = arith.constant 0 : index
    %15 = vector.load %arg5[%c0_14, %c0_15, %c0_16] : memref<1x2x8xf32, #tpu.memory_space<vmem>>, vector<1x2x8xf32>
    %16 = vector.shape_cast %15 : vector<1x2x8xf32> to vector<2x8xf32>
    %cst_17 = arith.constant dense<0.000000e+00> : vector<2x8xf32>
    %17 = vector.multi_reduction <add>, %4, %cst_17 [2] : vector<2x8x64xf32> to vector<2x8xf32>
    %cst_18 = arith.constant dense<0.000000e+00> : vector<2x8xf32>
    %18 = vector.multi_reduction <add>, %6, %cst_18 [2] : vector<2x8x64xf32> to vector<2x8xf32>
    %19 = arith.addf %17, %18 : vector<2x8xf32>
    %20 = arith.addf %16, %19 : vector<2x8xf32>
    %c0_19 = arith.constant 0 : index
    %c0_20 = arith.constant 0 : index
    %c0_21 = arith.constant 0 : index
    %21 = vector.load %arg5[%c0_19, %c0_20, %c0_21] : memref<1x2x8xf32, #tpu.memory_space<vmem>>, vector<1x2x8xf32>
    %22 = vector.shape_cast %21 : vector<1x2x8xf32> to vector<2x8xf32>
    %23 = vector.shape_cast %20 : vector<2x8xf32> to vector<1x2x8xf32>
    tpu.vector_store %arg5[%c0_19, %c0_20, %c0_21], %23 {strides = array<i32>} : memref<1x2x8xf32, #tpu.memory_space<vmem>>, vector<1x2x8xf32>,
    return
  }
  func.func @transform_0(%arg0: i32, %arg1: i32) -> (i32, i32, i32, i32) {
    %c0_i32 = arith.constant 0 : i32
    %c0_i32_0 = arith.constant 0 : i32
    %c0_i32_1 = arith.constant 0 : i32
    return %c0_i32, %arg0, %c0_i32_0, %arg1 : i32, i32, i32, i32
  }
  func.func @transform_1(%arg0: i32, %arg1: i32) -> (i32, i32, i32, i32) {
    %c0_i32 = arith.constant 0 : i32
    %c0_i32_0 = arith.constant 0 : i32
    %c0_i32_1 = arith.constant 0 : i32
    return %c0_i32, %arg0, %c0_i32_0, %arg1 : i32, i32, i32, i32
  }
  func.func @transform_2(%arg0: i32, %arg1: i32) -> (i32, i32, i32) {
    %c0_i32 = arith.constant 0 : i32
    %c0_i32_0 = arith.constant 0 : i32
    %c0_i32_1 = arith.constant 0 : i32
    return %arg0, %c0_i32, %c0_i32_0 : i32, i32, i32
  }
  func.func @transform_3(%arg0: i32, %arg1: i32) -> (i32, i32, i32) {
    %c0_i32 = arith.constant 0 : i32
    %c0_i32_0 = arith.constant 0 : i32
    %c0_i32_1 = arith.constant 0 : i32
    return %arg0, %c0_i32, %c0_i32_0 : i32, i32, i32
  }
}

</mosaic_0001>

<bundles_post_ra>
// kernel: dice_loss.1
= control target key start
LH: loop header
LB: loop body
LE: loop exit
PB: predicated region body
PF: predicated region fallthrough
CT: control target
= control target key end

     0   :  { %s597_s12 = smov 0   ;;  %s599_s13 = smov 0   ;;  %s689_s0 = inlined_call_operand.vmem [shape: f32[2,2,8,64], index: 0, kind: input, shape index: {}]   ;;  %s690_s1 = inlined_call_operand.vmem [shape: f32[2,2,8,64], index: 1, kind: input, shape index: {}]   ;;  %s691_s2 = inlined_call_operand.vmem [shape: f32[2,2,8], index: 2, kind: output, shape index: {0}]   ;;  %s692_s3 = inlined_call_operand.vmem [shape: f32[2,2,8], index: 3, kind: output, shape index: {1}]  }
   0x1   :  { %s601_s14 = smov 0   ;;  %s603_s15 = smov 0  }
   0x2   :  { %s605_s16 = smov 0  }
   0x3 LB: > { %s26_s17 = sadd.s32 1, %s570_s15  ;;  %p42_p1 = scmp.ne.s32.totalorder %s562_s13, %s558_s12  ;;  %s574_s16 = sphi %s605_s16, %s14_s16   ;;  %s570_s15 = sphi %s603_s15, %s697_s15   ;;  %s566_s14 = sphi %s601_s14, %s696_s14   ;;  %s562_s13 = sphi %s599_s13, %s695_s13   ;;  %s558_s12 = sphi %s597_s12, %s694_s12  }
   0x4   : > { %p28_p0 = scmp.ge.s32.totalorder %s26_s17, 2  ;;  %p43_p2 = scmp.eq.s32.totalorder %s574_s16, 0 }
   0x5   : > { %s35_s20 = sadd.s32 1, %s562_s13  ;;  %p483_p5 = scmp.ge.s32.totalorder %s574_s16, 2 }
   0x6   : > { %s699_s17 = smov (%p28_p0, %s26_s17), 0  ;;  %p628_p3 = por %p43_p2, %p42_p1 }
   0x7   : > { %s30_s19 = ssub.s32 %s570_s15, %s699_s17  ;;  %148 = sbr.rel (%p483_p5) target bundleno = 28 (0x1c), region = 16 }
   0x8   : > { %p33_p4 = scmp.eq.s32.totalorder %s30_s19, 0 }
   0xa   : > { %s636_s21 = scalar_select %p33_p4, %s562_s13, %s35_s20  }
   0xe   : > { %151 = sbr.rel (!%p628_p3) target bundleno = 21 (0x15), region = 20  ;;  %s153_s22 = sand.u32 (%p628_p3), 1, %s562_s13  }
   0xf   : > { %s485_s23 = sshll.u32 (%p628_p3), %s570_s15, 3  ;;  %s484_s24 = sshll.u32 (%p628_p3), %s153_s22, 4 }
  0x10   : > { %s158_s27 = scalar_lea.vmem (%p628_p3), %s689_s0, %s485_s23  ;;  %s155_s28 = scalar_lea.vmem (%p628_p3), [#allocation2], %s484_s24 }
  0x11   : > { %v188_v0 = vld [vmem:[%s158_s27] sm:$0xff] (%p628_p3)  ;;  %v190_v1 = vld [vmem:[%s158_s27 + $0x10] sm:$0xff] (%p628_p3) }
  0x12   : > { %189 = vst [vmem:[%s155_s28] sm:$0xff] (%p628_p3), %v188_v0  ;;  %191 = vst [vmem:[%s155_s28 + $0x8] sm:$0xff] (%p628_p3), %v190_v1 }
  0x15 PF: > { %197 = sbr.rel (!%p628_p3) target bundleno = 28 (0x1c), region = 58  ;;  %s199_s29 = sand.u32 (%p628_p3), 1, %s562_s13  }
  0x16   : > { %s487_s30 = sshll.u32 (%p628_p3), %s570_s15, 3  ;;  %s486_s4 = sshll.u32 (%p628_p3), %s199_s29, 4 }
  0x17   : > { %s204_s7 = scalar_lea.vmem (%p628_p3), %s690_s1, %s487_s30  ;;  %s201_s8 = scalar_lea.vmem (%p628_p3), [#allocation3], %s486_s4 }
  0x18   : > { %v234_v2 = vld [vmem:[%s204_s7] sm:$0xff] (%p628_p3)  ;;  %v236_v3 = vld [vmem:[%s204_s7 + $0x10] sm:$0xff] (%p628_p3) }
  0x19   : > { %235 = vst [vmem:[%s201_s8] sm:$0xff] (%p628_p3), %v234_v2  ;;  %237 = vst [vmem:[%s201_s8 + $0x8] sm:$0xff] (%p628_p3), %v236_v3 }
  0x1c PF: > { %p488_p6 = scmp.ge.s32.totalorder %s574_s16, 1  ;;  %p242_p7 = scmp.lt.s32.totalorder %s574_s16, 3 }
  0x1e   : > { %p243_p8 = pnand %p488_p6, %p242_p7 }
  0x1f   : > { %s249_s9 = sand.u32 (!%p243_p8), 1, %s558_s12   ;;  %vm308_vm0 = vcmask (!%p243_p8), 523264   ;;  %p286_p9 = scmp.lt.s32.totalorder (!%p243_p8), %s566_s14, 1  ;;  %vm298_vm1 = vcmask (!%p243_p8), 58368   ;;  %v576_v16 = vmov (!%p243_p8), 0.0   ;;  %v317_v17 = vlaneseq (!%p243_p8) }
  0x20   : > { %246 = sbr.rel (%p243_p8) target bundleno = 193 (0xc1), region = 96  ;;  %s489_s10 = sshll.u32 (!%p243_p8), %s249_s9, 4  ;;  %vm327_vm2 = vcmask (!%p243_p8), 1041409  }
  0x21   : > { %s258_s11 = scalar_lea.vmem (!%p243_p8), [#allocation3], %s489_s10  ;;  %s251_s18 = scalar_lea.vmem (!%p243_p8), [#allocation2], %s489_s10  ;;  %v318_v18 = vand.u32 (!%p243_p8), 127, %v317_v17  ;;  %v320_v19 = vshrl.u32 (!%p243_p8), %v317_v17, 7 }
  0x22   : > { %v303_v4 = vld [vmem:[%s258_s11] sm:$0xff] (!%p243_p8)  ;;  %v304_v6 = vld [vmem:[%s258_s11 + $0x8] sm:$0xff] (!%p243_p8) }
  0x23   : > { %v301_v5 = vld [vmem:[%s251_s18] sm:$0xff] (!%p243_p8)  ;;  %v340_v7 = vsel (!%p243_p8), %vm308_vm0, %v303_v4, 0.0  ;;  %v302_v9 = vld [vmem:[%s251_s18 + $0x8] sm:$0xff] (!%p243_p8)  ;;  %v343_v11 = vsel (!%p243_p8), %vm308_vm0, %v304_v6, 0.0  ;;  %v321_v22 = vsub.s32 (!%p243_p8), %v318_v18, %v320_v19 }
  0x24   : > { %v334_v8 = vsel (!%p243_p8), %vm308_vm0, %v301_v5, 0.0  ;;  %341 = vadd.xlane.f32.xlu1 (!%p243_p8), %v340_v7  ;;  %v306_v10 = vmul.f32 (!%p243_p8), %v303_v4, %v301_v5  ;;  %v337_v12 = vsel (!%p243_p8), %vm308_vm0, %v302_v9, 0.0  ;;  %v307_v13 = vmul.f32 (!%p243_p8), %v304_v6, %v302_v9 }
  0x25   : > { %335 = vadd.xlane.f32.xlu0 (!%p243_p8), %v334_v8 }
  0x26   : > { %v312_v14 = vsel (!%p243_p8), %vm308_vm0, %v307_v13, 0.0  ;;  %v309_v15 = vsel (!%p243_p8), %vm308_vm0, %v306_v10, 0.0 }
  0x27   : > { %s701_s14 = smov (!%p286_p9, %s566_s14), 1 }
  0x28   : > { %344 = vadd.xlane.f32.xlu1 %v343_v11  ;;  %s491_s12 = sshll.u32 %s701_s14, 1 }
  0x29   : > { %338 = vadd.xlane.f32.xlu0 %v337_v12  ;;  %s293_s22 = scalar_lea.vmem %s692_s3, %s491_s12  ;;  %s289_s25 = scalar_lea.vmem %s691_s2, %s491_s12 }
  0x2a   : > { %300 = vst.msk [vmem:[%s293_s22] sm:$0x3] %vm298_vm1, %v576_v16  ;;  %299 = vst.msk [vmem:[%s289_s25] sm:$0x3] %vm298_vm1, %v576_v16 }
  0x2c   : > { %313 = vadd.xlane.f32.xlu1 %v312_v14 }
  0x2d   : > { %310 = vadd.xlane.f32.xlu0 %v309_v15 }
  0x31   : > { %v333_v28 = vld [vmem:[%s293_s22] sm:$0x3] }
  0x32   : > { %v305_v34 = vld [vmem:[%s289_s25] sm:$0x3] }
  0xb1   : > { %v342_v20 = vpop.xlane.xlu1 %341 }
  0xb2   : > { %v336_v21 = vpop.xlane.xlu0 %335 }
  0xb3   : > { %v346_v23 = vadd.f32 %v342_v20, %v336_v21 }
  0xb5   : > { %v345_v24 = vpop.xlane.xlu1 %344  ;;  %v353_v27 = vrot.slane %v346_v23, %v321_v22 }
  0xb6   : > { %v339_v25 = vpop.xlane.xlu0 %338 }
  0xb7   : > { %v347_v26 = vadd.f32 %v345_v24, %v339_v25 }
  0xb9   : > { %v357_v29 = vrot.slane %v347_v26, %v321_v22  ;;  %v314_v30 = vpop.xlane.xlu1 %313 }
  0xba   : > { %v311_v31 = vpop.xlane.xlu0 %310  ;;  %v326_v33 = vrot.slane %v314_v30, %v321_v22 }
  0xbb   : > { %v358_v32 = vsel %vm327_vm2, %v357_v29, %v353_v27  ;;  %v322_v35 = vrot.slane %v311_v31, %v321_v22 }
  0xbc   : > { %v360_v36 = vadd.f32 %v358_v32, %v333_v28 }
  0xbd   : > { %v328_v37 = vsel %vm327_vm2, %v326_v33, %v322_v35 }
  0xbe   : > { %361 = vst.msk [vmem:[%s293_s22] sm:$0x3] %vm298_vm1, %v360_v36  ;;  %v330_v38 = vadd.f32 %v328_v37, %v305_v34 }
  0xc0   : > { %332 = vst.msk [vmem:[%s289_s25] sm:$0x3] %vm298_vm1, %v330_v38 }
  0xc1 PF: > { %s14_s16 = sadd.s32 1, %s574_s16   ;;  %s694_s12 = smov %s562_s13 }
  0xc2   : > { %p11_p10 = scmp.ge.s32.totalorder %s14_s16, 4   ;;  %s695_s13 = smov %s636_s21 }
  0xc3   : > { %s696_s14 = smov %s570_s15  ;;  %s697_s15 = smov %s699_s17 }
  0xc4   :  { %13 = sbr.rel (!%p11_p10) target bundleno = 3 (0x3), region = 163 }

</bundles_post_ra>
